<compile_context>
chip_gen: v5e
topology: v5e:2x2
jax: 0.10.0
libtpu: 0.0.40
codegen_flags: <defaults>
</compile_context>

<pallas_src>
import functools

import jax
import jax.numpy as jnp
from jax import lax
from jax.experimental import pallas as pl
from jax.experimental.pallas import tpu as pltpu


# ----------------------------------------------------------------------------
# Kernel
# ----------------------------------------------------------------------------
def _jsd_loss_kernel(local_ref, global_ref, tgt_ref, out_ref, *,
                     n_rows, tn, mask_rows):
    """One (TN, C) row tile -> scalar partial sum, written as a dense slab."""
    pid = pl.program_id(0)

    # Cast to f32 *after* the VMEM load (HBM traffic stays in the native
    # dtype; v5e has no bf16 VPU/EUP so all math stays f32).
    local = local_ref[...].astype(jnp.float32)        # (TN, C)
    glob = global_ref[...].astype(jnp.float32)        # (TN, C)
    tgt = tgt_ref[...]                                # (TN, 1) int32
    c = local.shape[-1]

    if mask_rows:
        # Ragged last tile: rows >= n_rows hold unspecified data (possibly
        # NaN/Inf).  Select them to 0.0 BEFORE any exp/log so nothing can
        # poison the partial sum (jnp.where does not propagate the unselected
        # branch).
        row_ids = pid * tn + lax.broadcasted_iota(jnp.int32, (tn, 1), 0)
        valid_col = row_ids < n_rows                  # (TN, 1) bool
        local = jnp.where(valid_col, local, 0.0)
        glob = jnp.where(valid_col, glob, 0.0)

    # --- shared shifted exponentials: one exp pass per input ----------------
    lmax = jnp.max(local, axis=-1, keepdims=True)
    e_l = jnp.exp(local - lmax)
    s_l = jnp.sum(e_l, axis=-1, keepdims=True)
    lse_l = jnp.log(s_l) + lmax                       # logsumexp(local), for CE
    sm_l = e_l * (1.0 / s_l)                          # softmax(local)

    gmax = jnp.max(glob, axis=-1, keepdims=True)
    e_g = jnp.exp(glob - gmax)
    s_g = jnp.sum(e_g, axis=-1, keepdims=True)
    sm_g = e_g * (1.0 / s_g)                          # softmax(global)
    # NOTE: lse_g is NOT needed — see the algebraic fold below.

    # --- cross-entropy rows: lse_l - local[target] --------------------------
    col = lax.broadcasted_iota(jnp.int32, (tn, c), 1)
    picked = jnp.sum(jnp.where(col == tgt, local, 0.0), axis=-1, keepdims=True)
    ce_rows = lse_l - picked                          # (TN, 1)

    # --- JSD rows ------------------------------------------------------------
    # sum_c (sm_l - sm_g) * (p - q)
    #   == sum_c (sm_l - sm_g) * (local - glob)
    # because the row-constant (lse_g - lse_l) term multiplies
    # sum_c(sm_l - sm_g) == 0.  Saves two full-tile passes + one temporary.
    jsd_rows = jnp.sum((sm_l - sm_g) * (local - glob), axis=-1, keepdims=True)

    rows = ce_rows + 0.25 * jsd_rows                  # (TN, 1)
    if mask_rows:
        rows = jnp.where(valid_col, rows, 0.0)

    partial = jnp.sum(rows)
    # Lane/sublane-dense (1, 8, 128) store; wrapper reads [:, 0, 0].
    out_ref[...] = jnp.broadcast_to(partial, out_ref.shape).astype(jnp.float32)


# ----------------------------------------------------------------------------
# Tiling / VMEM sizing helpers
# ----------------------------------------------------------------------------
def _physical_vmem_bytes():
    """Physical VMEM capacity (v5e/v6e 128 MiB, v7x 64 MiB); conservative fallback."""
    try:
        info = pltpu.get_tpu_info()
        cap = getattr(info, "vmem_capacity_bytes", None)
        if cap:
            return int(cap)
    except Exception:
        pass
    return 64 * 1024 * 1024     # smallest of the supported generations (v7x)


def _row_align(itemsize):
    """Sublane-packing alignment: 8 rows for f32, 16 for bf16, 32 for 8-bit."""
    return max(8, 32 // max(int(itemsize), 1))


def _per_row_vmem_bytes(c, itemsize):
    """Estimated VMEM bytes per logit row:
       2 inputs x 2 pipeline buffers (native dtype)
     + ~8 full-tile f32/int32 temporaries in the body
       (casted local/glob, e_l, e_g, sm_l, sm_g, diff, col iota)
     + targets (TN,1) int32 block lane-padded to 1 vreg per 8 rows x 2 buffers.
    """
    return 4 * c * itemsize + 8 * c * 4 + 1024


def _choose_row_tile(n, c, itemsize, align, physical_vmem):
    """Largest sublane-aligned TN whose full footprint fits ~40% of VMEM,
    while guaranteeing >= 2 grid tiles when possible (so both v7x TCs run)."""
    budget = (physical_vmem * 2) // 5                  # ~40% of physical VMEM
    per_row = _per_row_vmem_bytes(c, itemsize)
    tn = budget // max(per_row, 1)

    half = -(-n // 2)                                  # ceil(n / 2)
    half = -(-half // align) * align                   # round up to alignment
    n_aligned = -(-n // align) * align

    tn = min(tn, half, 4096, n_aligned)
    tn = max(align, (tn // align) * align)
    return tn


# ----------------------------------------------------------------------------
# Wrapper
# ----------------------------------------------------------------------------
def jsd_loss(local_logits, targets, global_logits, *, row_tile=None):
    """Pallas implementation of JSDLoss.forward. Returns a scalar float32."""
    n, c = local_logits.shape
    itemsize = jnp.dtype(local_logits.dtype).itemsize
    align = _row_align(itemsize)
    physical_vmem = _physical_vmem_bytes()

    if row_tile is None:
        tn = _choose_row_tile(n, c, itemsize, align, physical_vmem)
    else:
        tn = max(align, (int(row_tile) // align) * align)

    num_tiles = pl.cdiv(n, tn)
    n_pad = num_tiles * tn
    mask_rows = (n % tn) != 0

    # Only the tiny int32 targets vector is ever padded — the (N, C) logits
    # are consumed in place (no full-array copy).
    tgt = targets.astype(jnp.int32)
    if n_pad != n:
        tgt = jnp.pad(tgt, ((0, n_pad - n),))
    tgt = tgt.reshape(n_pad, 1)

    kernel = functools.partial(_jsd_loss_kernel, n_rows=n, tn=tn,
                               mask_rows=mask_rows)

    grid_spec = pltpu.PrefetchScalarGridSpec(
        num_scalar_prefetch=0,
        grid=(num_tiles,),
        in_specs=[
            pl.BlockSpec((tn, c), lambda i: (i, 0)),   # local logits tile
            pl.BlockSpec((tn, c), lambda i: (i, 0)),   # global logits tile
            pl.BlockSpec((tn, 1), lambda i: (i, 0)),   # targets tile
        ],
        out_specs=pl.BlockSpec((1, 8, 128), lambda i: (i, 0, 0)),
    )

    # Explicit scoped-VMEM limit covering buffers + in-kernel temporaries
    # (the default scoped limit is 16 MiB on v5e / 32 MiB on v6e-v7x).
    footprint = tn * _per_row_vmem_bytes(c, itemsize) + (1 << 20)
    vmem_limit = int(min(physical_vmem * 3 // 4, max(footprint, 32 << 20)))

    cost = pl.CostEstimate(
        flops=10 * n * c,
        transcendentals=2 * n * c,
        bytes_accessed=2 * n * c * itemsize + n_pad * 4 + num_tiles * 8 * 128 * 4,
    )

    partials = pl.pallas_call(
        kernel,
        out_shape=jax.ShapeDtypeStruct((num_tiles, 8, 128), jnp.float32),
        grid_spec=grid_spec,
        compiler_params=pltpu.CompilerParams(
            dimension_semantics=("parallel",),   # shard tiles across TCs on v7x
            vmem_limit_bytes=vmem_limit,
        ),
        cost_estimate=cost,
    )(local_logits, global_logits, tgt)

    return jnp.sum(partials[:, 0, 0]) / jnp.float32(n)


# ----------------------------------------------------------------------------
# Pure-JAX reference (mirrors the PyTorch forward)
# ----------------------------------------------------------------------------
def _jsd_loss_ref(local_logits, targets, global_logits):
    n = local_logits.shape[0]
    x_l = local_logits.astype(jnp.float32)
    x_g = global_logits.astype(jnp.float32)
    p = jax.nn.log_softmax(x_l, axis=-1)
    q = jax.nn.log_softmax(x_g, axis=-1)
    ce = -jnp.mean(jnp.take_along_axis(p, targets[:, None], axis=-1))
    m = 0.5 * (p + q)
    kl_mp = jnp.sum(jnp.exp(p) * (p - m)) / n
    kl_mq = jnp.sum(jnp.exp(q) * (q - m)) / n
    return ce + 0.5 * (kl_mp + kl_mq)


if __name__ == "__main__":
    key = jax.random.PRNGKey(0)
    keys = jax.random.split(key, 9)

    # Case 1: small f32 logits, automatic tile choice (single dense tile).
    N, C = 8, 32
    local1 = jax.random.normal(keys[0], (N, C), dtype=jnp.float32)
    global1 = jax.random.normal(keys[1], (N, C), dtype=jnp.float32)
    targets1 = jax.random.randint(keys[2], (N,), 0, C, dtype=jnp.int32)
    loss1 = jsd_loss(local1, targets1, global1)
    jax.block_until_ready(loss1)
    ref1 = _jsd_loss_ref(local1, targets1, global1)
    assert jnp.allclose(loss1, ref1, rtol=1e-4, atol=1e-4), (loss1, ref1)

    # Case 2: N not a multiple of the (forced small) row tile and C not a
    # multiple of 128 -> exercises the multi-tile grid, pipelining, and the
    # in-kernel ragged-row masking (no wrapper pad of the logits).
    N2, C2 = 20, 200
    local2 = jax.random.normal(keys[3], (N2, C2), dtype=jnp.float32)
    global2 = jax.random.normal(keys[4], (N2, C2), dtype=jnp.float32)
    targets2 = jax.random.randint(keys[5], (N2,), 0, C2, dtype=jnp.int32)
    loss2 = jsd_loss(local2, targets2, global2, row_tile=8)
    jax.block_until_ready(loss2)
    ref2 = _jsd_loss_ref(local2, targets2, global2)
    assert jnp.allclose(loss2, ref2, rtol=1e-4, atol=1e-4), (loss2, ref2)

    # Case 3: bf16 logits (HBM stays bf16, cast to f32 after the VMEM load),
    # 16-row sublane alignment, automatic >=2-tile split + ragged last tile.
    N3, C3 = 24, 256
    local3 = jax.random.normal(keys[6], (N3, C3), dtype=jnp.float32).astype(jnp.bfloat16)
    global3 = jax.random.normal(keys[7], (N3, C3), dtype=jnp.float32).astype(jnp.bfloat16)
    targets3 = jax.random.randint(keys[8], (N3,), 0, C3, dtype=jnp.int32)
    loss3 = jsd_loss(local3, targets3, global3)
    jax.block_until_ready(loss3)
    ref3 = _jsd_loss_ref(local3, targets3, global3)
    assert jnp.allclose(loss3, ref3, rtol=1e-3, atol=1e-3), (loss3, ref3)

    print("KERNEL_OK")
</pallas_src>

<mosaic_0001>
module attributes {stable_mosaic.version = 11 : i64} {
  func.func @_jsd_loss_kernel(%arg0: i32, %arg1: memref<8x32xf32, #tpu.memory_space<vmem>>, %arg2: memref<8x32xf32, #tpu.memory_space<vmem>>, %arg3: memref<8x1xi32, #tpu.memory_space<vmem>>, %arg4: memref<1x8x128xf32, #tpu.memory_space<vmem>>) attributes {dimension_semantics = [#tpu.dimension_semantics<parallel>], iteration_bounds = array<i64: 1>, scalar_prefetch = 0 : i64, scratch_operands = 0 : i64, tpu.core_type = #tpu.core_type<tc>, window_params = [{transform_indices = @transform_0, window_bounds = array<i64: 8, 32>}, {transform_indices = @transform_1, window_bounds = array<i64: 8, 32>}, {transform_indices = @transform_2, window_bounds = array<i64: 8, 1>}, {transform_indices = @transform_3, window_bounds = array<i64: 1, 8, 128>}]} {
    %c0 = arith.constant 0 : index
    %c0_0 = arith.constant 0 : index
    %0 = vector.load %arg1[%c0, %c0_0] : memref<8x32xf32, #tpu.memory_space<vmem>>, vector<8x32xf32>
    %c0_1 = arith.constant 0 : index
    %c0_2 = arith.constant 0 : index
    %1 = vector.load %arg2[%c0_1, %c0_2] : memref<8x32xf32, #tpu.memory_space<vmem>>, vector<8x32xf32>
    %c0_3 = arith.constant 0 : index
    %c0_4 = arith.constant 0 : index
    %2 = vector.load %arg3[%c0_3, %c0_4] : memref<8x1xi32, #tpu.memory_space<vmem>>, vector<8x1xi32>
    %cst = arith.constant dense<0xFF800000> : vector<8xf32>
    %3 = vector.multi_reduction <maximumf>, %0, %cst [1] : vector<8x32xf32> to vector<8xf32>
    %4 = vector.shape_cast %3 : vector<8xf32> to vector<8x1xf32>
    %5 = vector.broadcast %4 : vector<8x1xf32> to vector<8x32xf32>
    %6 = arith.subf %0, %5 : vector<8x32xf32>
    %7 = math.exp %6 : vector<8x32xf32>
    %cst_5 = arith.constant dense<0.000000e+00> : vector<8xf32>
    %8 = vector.multi_reduction <add>, %7, %cst_5 [1] : vector<8x32xf32> to vector<8xf32>
    %9 = vector.shape_cast %8 : vector<8xf32> to vector<8x1xf32>
    %10 = math.log %9 : vector<8x1xf32>
    %11 = arith.addf %10, %4 : vector<8x1xf32>
    %cst_6 = arith.constant 1.000000e+00 : f32
    %12 = vector.broadcast %cst_6 : f32 to vector<8x1xf32>
    %13 = arith.divf %12, %9 : vector<8x1xf32>
    %14 = vector.broadcast %13 : vector<8x1xf32> to vector<8x32xf32>
    %15 = arith.mulf %7, %14 : vector<8x32xf32>
    %cst_7 = arith.constant dense<0xFF800000> : vector<8xf32>
    %16 = vector.multi_reduction <maximumf>, %1, %cst_7 [1] : vector<8x32xf32> to vector<8xf32>
    %17 = vector.shape_cast %16 : vector<8xf32> to vector<8x1xf32>
    %18 = vector.broadcast %17 : vector<8x1xf32> to vector<8x32xf32>
    %19 = arith.subf %1, %18 : vector<8x32xf32>
    %20 = math.exp %19 : vector<8x32xf32>
    %cst_8 = arith.constant dense<0.000000e+00> : vector<8xf32>
    %21 = vector.multi_reduction <add>, %20, %cst_8 [1] : vector<8x32xf32> to vector<8xf32>
    %22 = vector.shape_cast %21 : vector<8xf32> to vector<8x1xf32>
    %cst_9 = arith.constant 1.000000e+00 : f32
    %23 = vector.broadcast %cst_9 : f32 to vector<8x1xf32>
    %24 = arith.divf %23, %22 : vector<8x1xf32>
    %25 = vector.broadcast %24 : vector<8x1xf32> to vector<8x32xf32>
    %26 = arith.mulf %20, %25 : vector<8x32xf32>
    %27 = tpu.iota {dimensions = array<i32: 1>} : vector<8x32xi32>
    %28 = vector.broadcast %2 : vector<8x1xi32> to vector<8x32xi32>
    %29 = arith.cmpi eq, %27, %28 : vector<8x32xi32>
    %cst_10 = arith.constant 0.000000e+00 : f32
    %30 = vector.broadcast %cst_10 : f32 to vector<8x32xf32>
    %31 = arith.select %29, %0, %30 : vector<8x32xi1>, vector<8x32xf32>
    %cst_11 = arith.constant dense<0.000000e+00> : vector<8xf32>
    %32 = vector.multi_reduction <add>, %31, %cst_11 [1] : vector<8x32xf32> to vector<8xf32>
    %33 = vector.shape_cast %32 : vector<8xf32> to vector<8x1xf32>
    %34 = arith.subf %11, %33 : vector<8x1xf32>
    %35 = arith.subf %15, %26 : vector<8x32xf32>
    %36 = arith.subf %0, %1 : vector<8x32xf32>
    %37 = arith.mulf %35, %36 : vector<8x32xf32>
    %cst_12 = arith.constant dense<0.000000e+00> : vector<8xf32>
    %38 = vector.multi_reduction <add>, %37, %cst_12 [1] : vector<8x32xf32> to vector<8xf32>
    %39 = vector.shape_cast %38 : vector<8xf32> to vector<8x1xf32>
    %cst_13 = arith.constant 2.500000e-01 : f32
    %40 = vector.broadcast %cst_13 : f32 to vector<8x1xf32>
    %41 = arith.mulf %40, %39 : vector<8x1xf32>
    %42 = arith.addf %34, %41 : vector<8x1xf32>
    %43 = vector.shape_cast %42 : vector<8x1xf32> to vector<1x8x1xf32>
    %cst_14 = arith.constant dense<0.000000e+00> : vector<1xf32>
    %44 = vector.multi_reduction <add>, %43, %cst_14 [1, 2] : vector<1x8x1xf32> to vector<1xf32>
    %45 = vector.shape_cast %44 : vector<1xf32> to vector<1x1x1xf32>
    %46 = vector.extract %45[0, 0, 0] : f32 from vector<1x1x1xf32>
    %47 = vector.broadcast %46 : f32 to vector<1x8x128xf32>
    %c0_15 = arith.constant 0 : index
    %c0_16 = arith.constant 0 : index
    %c0_17 = arith.constant 0 : index
    %48 = vector.load %arg4[%c0_15, %c0_16, %c0_17] : memref<1x8x128xf32, #tpu.memory_space<vmem>>, vector<1x8x128xf32>
    tpu.vector_store %arg4[%c0_15, %c0_16, %c0_17], %47 {strides = array<i32>} : memref<1x8x128xf32, #tpu.memory_space<vmem>>, vector<1x8x128xf32>,
    return
  }
  func.func @transform_0(%arg0: i32) -> (i32, i32) {
    %c0_i32 = arith.constant 0 : i32
    %c0_i32_0 = arith.constant 0 : i32
    return %arg0, %c0_i32 : i32, i32
  }
  func.func @transform_1(%arg0: i32) -> (i32, i32) {
    %c0_i32 = arith.constant 0 : i32
    %c0_i32_0 = arith.constant 0 : i32
    return %arg0, %c0_i32 : i32, i32
  }
  func.func @transform_2(%arg0: i32) -> (i32, i32) {
    %c0_i32 = arith.constant 0 : i32
    %c0_i32_0 = arith.constant 0 : i32
    return %arg0, %c0_i32 : i32, i32
  }
  func.func @transform_3(%arg0: i32) -> (i32, i32, i32) {
    %c0_i32 = arith.constant 0 : i32
    %c0_i32_0 = arith.constant 0 : i32
    %c0_i32_1 = arith.constant 0 : i32
    return %arg0, %c0_i32, %c0_i32_0 : i32, i32, i32
  }
}

</mosaic_0001>

<bundles_post_ra>
// kernel: tpu_custom_call.1
= control target key start
LH: loop header
LB: loop body
LE: loop exit
PB: predicated region body
PF: predicated region fallthrough
CT: control target
= control target key end

     0   :  { %8 = vsyncpa [#allocation3], 0  ;;  %s251_s0 = inlined_call_operand.vmem [shape: f32[8,32], index: 0, kind: input, shape index: {}]   ;;  %s252_s1 = inlined_call_operand.hbm [shape: f32[8,32], index: 1, kind: input, shape index: {}]   ;;  %s253_s2 = inlined_call_operand.vmem [shape: s32[8,1], index: 2, kind: input, shape index: {}]   ;;  %s254_s3 = inlined_call_operand.hbm [shape: f32[1,8,128], index: 3, kind: output, shape index: {}]  }
   0x1   :  { %9 = vsyncpa [#allocation4], 0  ;;  %s17_s14 = sshll.u32 %s252_s1, 4  ;;  %s204_s15 = smov [#allocation2]   ;;  %s18_s14 = int_to_ptr.hbm [resolvable:$true] %s17_s14 }
   0x2   :  { %s19_s16 = sshll.u32 %s204_s15, 4  ;;  %s20_s16 = int_to_ptr.vmem [resolvable:$true] %s19_s16 }
   0x3   :  { %22 = dma.hbm_to_vmem [thread:$0]  %s18_s14, 128, %s20_s16, [#allocation3]  }
   0x4   :  { %200 = dma.done.wait [#allocation3], 128  }
   0x5   :  { %201 = vsyncadd [#allocation3], 4294967168  ;;  %v205_v0 = vmov 0   ;;  %vm32_vm0 = vcmask 261120   ;;  %v233_v1 = vld [vmem:[%s251_s0] sm:$0xff]  ;;  %v86_v6 = vlaneseq  ;;  %vm105_vm10 = vcmask 7168  }
   0x6   :  { %140 = vset.pattern.permute.xlu2 %v205_v0  ;;  %141 = vset.pattern.permute.xlu0 %v205_v0  ;;  %v31_v2 = vld [vmem:[%s253_s2] sm:$0xff]  ;;  %v33_v3 = vsel %vm32_vm0, %v233_v1, -inf  ;;  %s125_s2 = sshll.u32 %s254_s3, 4  ;;  %s206_s21 = smov [#allocation5]   ;;  %s126_s2 = int_to_ptr.hbm [resolvable:$true] %s125_s2 }
   0x7   :  { %89 = vperm.xlu2 %140, %v31_v2   ;;  %34 = vmax.xlane.f32.xlu0 %v33_v3  ;;  %v30_v4 = vld [vmem:[#allocation2] sm:$0xff]  ;;  %v87_v7 = vand.u32 127, %v86_v6  ;;  %s123_s22 = sshll.u32 %s206_s21, 4  ;;  %s124_s22 = int_to_ptr.vmem [resolvable:$true] %s123_s22 }
   0x8   :  { %v61_v5 = vsel %vm32_vm0, %v30_v4, -inf  ;;  %v98_v45 = vsub.f32 %v233_v1, %v30_v4 }
   0xf   :  { %62 = vmax.xlane.f32.xlu0 %v61_v5 }
  0x61   :  { %v90_v8 = vpop.permute.xlu2 %89 }
  0x62   :  { %vm91_vm1 = vcmp.eq.s32.totalorder %v87_v7, %v90_v8 }
  0x63   :  { %v92_v9 = vsel %vm91_vm1, %v233_v1, 0.0 }
  0x64   :  { %v93_v10 = vsel %vm32_vm0, %v92_v9, 0.0 }
  0x65   :  { %94 = vadd.xlane.f32.xlu2 %v93_v10 }
  0x7a   :  { %v35_v11 = vpop.xlane.xlu0 %34 }
  0x7b   :  { %v36_v12 = vsub.f32 %v233_v1, %v35_v11 }
  0x7d   :  { %v37_v13 = vmul.f32 1.442695, %v36_v12 }
  0x7f   :  { %142 = vpow2.f32 %v37_v13 }
  0x82   :  { %v63_v14 = vpop.xlane.xlu0 %62 }
  0x83   :  { %v64_v15 = vsub.f32 %v30_v4, %v63_v14 }
  0x85   :  { %v143_v16 = vpop.eup %142  ;;  %v65_v17 = vmul.f32 1.442695, %v64_v15 }
  0x86   :  { %v39_v18 = vsel %vm32_vm0, %v143_v16, 0.0 }
  0x87   :  { %144 = vpow2.f32 %v65_v17  ;;  %40 = vadd.xlane.f32.xlu1 %v39_v18 }
  0x8d   :  { %v145_v19 = vpop.eup %144 }
  0x8e   :  { %v67_v20 = vsel %vm32_vm0, %v145_v19, 0.0 }
  0x8f   :  { %68 = vadd.xlane.f32.xlu1 %v67_v20 }
  0xd8   :  { %v95_v52 = vpop.xlane.xlu2 %94 }
  0xfa   :  { %v41_v21 = vpop.xlane.xlu1 %40 }
  0xfb   :  { %146 = vrcp.f32 %v41_v21  ;;  %v56_v30 = vand.u32 2147483648, %v41_v21  ;;  %vm50_vm3 = vweird.f32 %v41_v21  ;;  %v54_v32 = vand.u32 2147483647, %v41_v21 }
  0xfd   :  { %v57_v37 = vor.u32 1.1754944e-38, %v56_v30  ;;  %vm55_vm7 = vcmp.eq.f32.partialorder %v54_v32, 8.507059e+37 }
 0x101   :  { %v147_v22 = vpop.eup %146 }
 0x102   :  { %v46_v23 = vmul.f32 %v147_v22, %v41_v21  ;;  %v69_v24 = vpop.xlane.xlu1 %68  ;;  %vm51_vm2 = vweird.f32 %v147_v22 }
 0x103   :  { %148 = vrcp.f32 %v69_v24  ;;  %v81_v33 = vand.u32 2147483648, %v69_v24  ;;  %vm52_vm4 = vmor %vm50_vm3, %vm51_vm2  ;;  %v79_v35 = vand.u32 2147483647, %v69_v24  ;;  %vm75_vm6 = vweird.f32 %v69_v24 }
 0x104   :  { %v47_v25 = vsub.f32 1.0, %v46_v23  ;;  %150 = vlog2.f32 %v41_v21 }
 0x105   :  { %v82_v39 = vor.u32 1.1754944e-38, %v81_v33  ;;  %vm80_vm9 = vcmp.eq.f32.partialorder %v79_v35, 8.507059e+37 }
 0x106   :  { %v48_v26 = vmul.f32 %v147_v22, %v47_v25 }
 0x108   :  { %v49_v29 = vadd.f32 %v147_v22, %v48_v26 }
 0x109   :  { %v149_v27 = vpop.eup %148 }
 0x10a   :  { %v71_v28 = vmul.f32 %v149_v27, %v69_v24  ;;  %vm76_vm5 = vweird.f32 %v149_v27  ;;  %v53_v36 = vsel %vm52_vm4, %v147_v22, %v49_v29  ;;  %v151_v49 = vpop.eup %150 }
 0x10b   :  { %vm77_vm8 = vmor %vm75_vm6, %vm76_vm5  ;;  %v58_v40 = vsel %vm55_vm7, %v57_v37, %v53_v36  ;;  %v43_v50 = vmul.f32 0.6931472, %v151_v49 }
 0x10c   :  { %v72_v31 = vsub.f32 1.0, %v71_v28  ;;  %v60_v43 = vmul.f32 %v143_v16, %v58_v40 }
 0x10d   :  { %v44_v51 = vadd.f32 %v43_v50, %v35_v11 }
 0x10e   :  { %v73_v34 = vmul.f32 %v149_v27, %v72_v31 }
 0x10f   :  { %v96_v54 = vsub.f32 %v44_v51, %v95_v52 }
 0x110   :  { %v74_v38 = vadd.f32 %v149_v27, %v73_v34 }
 0x112   :  { %v78_v41 = vsel %vm77_vm8, %v149_v27, %v74_v38 }
 0x113   :  { %v83_v42 = vsel %vm80_vm9, %v82_v39, %v78_v41 }
 0x114   :  { %v85_v44 = vmul.f32 %v145_v19, %v83_v42 }
 0x116   :  { %v97_v46 = vsub.f32 %v60_v43, %v85_v44 }
 0x118   :  { %v99_v47 = vmul.f32 %v98_v45, %v97_v46 }
 0x11a   :  { %v100_v48 = vsel %vm32_vm0, %v99_v47, 0.0 }
 0x11b   :  { %101 = vadd.xlane.f32.xlu0 %v100_v48 }
 0x18e   :  { %v102_v53 = vpop.xlane.xlu0 %101 }
 0x18f   :  { %v103_v55 = vmul.f32 0.25, %v102_v53 }
 0x191   :  { %v104_v56 = vadd.f32 %v103_v55, %v96_v54 }
 0x193   :  { %v106_v57 = vsel %vm105_vm10, %v104_v56, 0.0 }
 0x194   :  { %107 = vadd.xlane.f32.xlu1 %v106_v57 }
 0x207   :  { %v108_v58 = vpop.xlane.xlu1 %107 }
 0x208   :  { %v109_v59 = vrot.slane %v108_v58, 4 }
 0x20a   :  { %v110_v60 = vadd.f32 %v109_v59, %v108_v58 }
 0x20c   :  { %v111_v61 = vrot.slane %v110_v60, 2 }
 0x20e   :  { %v112_v62 = vadd.f32 %v111_v61, %v110_v60 }
 0x210   :  { %v113_v63 = vrot.slane %v112_v62, 1 }
 0x212   :  { %v114_v0 = vadd.f32 %v113_v63, %v112_v62 }
 0x214   :  { %135 = vpush %v114_v0 }
 0x245   :  { %s136_s23 = spop %135 }
 0x246   :  { %v116_v1 = vstv %s136_s23 }
 0x247   :  { %117 = vst [vmem:[#allocation5] sm:$0xff] %v116_v1 }
 0x248   :  { %128 = dma.vmem_to_hbm [thread:$0]  %s124_s22, 128, %s126_s2, [#allocation4]  }
 0x249   :  { %202 = dma.done.wait [#allocation4], 128  }
 0x24a   :  { %203 = vsyncadd [#allocation4], 4294967168 }
 0x24b   :  { %133 = vsyncpa [#allocation3], 1 }
 0x24c   :  { %134 = vsyncpa [#allocation4], 1 }

</bundles_post_ra>
